<compile_context>
chip_gen: v7x
topology: tpu7x:2x2x1
jax: 0.10.0
libtpu: 0.0.40
codegen_flags: <defaults>
</compile_context>

<pallas_src>
import jax
import jax.numpy as jnp
from jax.experimental import pallas as pl
from jax.experimental.pallas import tpu as pltpu


# --------------------------------------------------------------------------- #
# Kernels                                                                     #
# --------------------------------------------------------------------------- #

def _trunk(s_ref, a_ref, w1s_ref, w1a_ref, b1_ref, w2_ref, b2_ref):
    """Shared MLP trunk: returns h2 = ReLU(ReLU([s|a] @ W1 + b1) @ W2 + b2)."""
    # Layer 1: folded concat -> two MXU matmuls (bf16 inputs, f32 accumulate).
    h1 = jnp.dot(s_ref[...].astype(jnp.bfloat16), w1s_ref[...],
                 preferred_element_type=jnp.float32)
    h1 = h1 + jnp.dot(a_ref[...].astype(jnp.bfloat16), w1a_ref[...],
                      preferred_element_type=jnp.float32)
    h1 = jnp.maximum(h1 + b1_ref[...], 0.0)                       # f32 VPU
    # Layer 2.
    h2 = jnp.dot(h1.astype(jnp.bfloat16), w2_ref[...],
                 preferred_element_type=jnp.float32)
    return jnp.maximum(h2 + b2_ref[...], 0.0)                     # f32 VPU


def _head(h2, wq_row_ref, bq_ref):
    """Linear(H,1) head as VPU multiply + lane reduction (wq stored as (1,H))."""
    return jnp.sum(h2 * wq_row_ref[...], axis=-1, keepdims=True) + bq_ref[...]


def _critic_q1_kernel(s_ref, a_ref, w1s_ref, w1a_ref, b1_ref, w2_ref, b2_ref,
                      wq1_ref, bq1_ref, q1_ref):
    h2 = _trunk(s_ref, a_ref, w1s_ref, w1a_ref, b1_ref, w2_ref, b2_ref)
    q1_ref[...] = _head(h2, wq1_ref, bq1_ref)


def _critic_q1_q2_kernel(s_ref, a_ref, w1s_ref, w1a_ref, b1_ref, w2_ref,
                         b2_ref, wq1_ref, bq1_ref, wq2_ref, bq2_ref,
                         q1_ref, q2_ref):
    h2 = _trunk(s_ref, a_ref, w1s_ref, w1a_ref, b1_ref, w2_ref, b2_ref)
    q1_ref[...] = _head(h2, wq1_ref, bq1_ref)
    q2_ref[...] = _head(h2, wq2_ref, bq2_ref)


# --------------------------------------------------------------------------- #
# Wrappers                                                                    #
# --------------------------------------------------------------------------- #

def _batch_tile(B, block_b):
    # Tile over batch only when it is large and divides evenly; otherwise run
    # a single fully-resident invocation (best on 1-TC v5e/v6e at small B).
    return block_b if (B > block_b and B % block_b == 0) else B


def _specs(B, S, A, H, tb, n_heads):
    batched = lambda shape: pl.BlockSpec(shape, lambda i: (i, 0))
    resident = lambda shape: pl.BlockSpec(shape, lambda i: (0, 0))
    in_specs = [
        batched((tb, S)),            # state
        batched((tb, A)),            # action
        resident((S, H)),            # w1_s (bf16)
        resident((A, H)),            # w1_a (bf16)
        resident((1, H)),            # b1
        resident((H, H)),            # w2  (bf16)
        resident((1, H)),            # b2
    ]
    for _ in range(n_heads):
        in_specs += [resident((1, H)), resident((1, 1))]   # wq row, bq
    out_spec = batched((tb, 1))
    return in_specs, out_spec


def critic_forward(state, action, params, *, block_b=256):
    """Pallas equivalent of Critic.forward -> q1 of shape (B, 1)."""
    state = state.astype(jnp.float32)
    action = action.astype(jnp.float32)
    B, S = state.shape
    A = action.shape[1]
    H = params["b1"].shape[1]
    tb = _batch_tile(B, block_b)
    in_specs, out_spec = _specs(B, S, A, H, tb, n_heads=1)

    return pl.pallas_call(
        _critic_q1_kernel,
        out_shape=jax.ShapeDtypeStruct((B, 1), jnp.float32),
        grid=(B // tb,),
        in_specs=in_specs,
        out_specs=out_spec,
        compiler_params=pltpu.CompilerParams(
            dimension_semantics=("parallel",)),   # shards batch across TCs on v7x
    )(state, action, params["w1_s"], params["w1_a"], params["b1"],
      params["w2"], params["b2"], params["wq1"], params["bq1"])


def critic_get_q1_q2(state, action, params, *, block_b=256):
    """Pallas equivalent of Critic.get_q1_q2 -> (q1, q2), each (B, 1).

    Twin heads fused into one pallas_call so the trunk activations / weight DMA
    and the per-kernel launch overhead are paid once.
    """
    state = state.astype(jnp.float32)
    action = action.astype(jnp.float32)
    B, S = state.shape
    A = action.shape[1]
    H = params["b1"].shape[1]
    tb = _batch_tile(B, block_b)
    in_specs, out_spec = _specs(B, S, A, H, tb, n_heads=2)

    return pl.pallas_call(
        _critic_q1_q2_kernel,
        out_shape=(jax.ShapeDtypeStruct((B, 1), jnp.float32),
                   jax.ShapeDtypeStruct((B, 1), jnp.float32)),
        grid=(B // tb,),
        in_specs=in_specs,
        out_specs=(out_spec, out_spec),
        compiler_params=pltpu.CompilerParams(
            dimension_semantics=("parallel",)),
    )(state, action, params["w1_s"], params["w1_a"], params["b1"],
      params["w2"], params["b2"], params["wq1"], params["bq1"],
      params["wq2"], params["bq2"])


# --------------------------------------------------------------------------- #
# Params (mirrors the PyTorch module's shapes / init scheme)                  #
# --------------------------------------------------------------------------- #

def init_critic_params(key, state_dim, hidden_dim, action_dim):
    k1, k2, k3, k4, k5, k6 = jax.random.split(key, 6)
    in_dim = state_dim + action_dim

    def linear_default(kw, kb, fan_in, fan_out):
        # PyTorch nn.Linear default: U(-1/sqrt(fan_in), 1/sqrt(fan_in))
        bound = 1.0 / jnp.sqrt(jnp.float32(fan_in))
        w = jax.random.uniform(kw, (fan_in, fan_out), jnp.float32, -bound, bound)
        b = jax.random.uniform(kb, (1, fan_out), jnp.float32, -bound, bound)
        return w, b

    w1, b1 = linear_default(k1, k2, in_dim, hidden_dim)
    w2, b2 = linear_default(k3, k4, hidden_dim, hidden_dim)

    # Heads: orthogonal_(std=0.1) on the torch (1, H) weight, bias = 1e-6.
    # Stored as lane-dense (1, H) rows (no transpose -> VPU head in-kernel).
    wq1 = jax.nn.initializers.orthogonal(scale=0.1)(k5, (1, hidden_dim),
                                                    jnp.float32)
    wq2 = jax.nn.initializers.orthogonal(scale=0.1)(k6, (1, hidden_dim),
                                                    jnp.float32)
    bq1 = jnp.full((1, 1), 1e-6, jnp.float32)
    bq2 = jnp.full((1, 1), 1e-6, jnp.float32)

    # Matmul weights stored in bf16 (one-time quantization of the storage
    # format): halves weight HBM->VMEM DMA and doubles MXU rate on v6e/v7x.
    return dict(
        w1_s=w1[:state_dim].astype(jnp.bfloat16),
        w1_a=w1[state_dim:].astype(jnp.bfloat16),
        b1=b1,
        w2=w2.astype(jnp.bfloat16),
        b2=b2,
        wq1=wq1, bq1=bq1,
        wq2=wq2, bq2=bq2,
    )


# --------------------------------------------------------------------------- #
# Pure-JAX references (use the same stored params, f32 math)                  #
# --------------------------------------------------------------------------- #

def _trunk_ref(state, action, p):
    w1s = p["w1_s"].astype(jnp.float32)
    w1a = p["w1_a"].astype(jnp.float32)
    w2 = p["w2"].astype(jnp.float32)
    h1 = jnp.maximum(state @ w1s + action @ w1a + p["b1"], 0.0)
    return jnp.maximum(h1 @ w2 + p["b2"], 0.0)


def critic_forward_ref(state, action, p):
    h2 = _trunk_ref(state, action, p)
    return jnp.sum(h2 * p["wq1"], axis=-1, keepdims=True) + p["bq1"]


def critic_get_q1_q2_ref(state, action, p):
    h2 = _trunk_ref(state, action, p)
    q1 = jnp.sum(h2 * p["wq1"], axis=-1, keepdims=True) + p["bq1"]
    q2 = jnp.sum(h2 * p["wq2"], axis=-1, keepdims=True) + p["bq2"]
    return q1, q2


# --------------------------------------------------------------------------- #
# Smoke test                                                                  #
# --------------------------------------------------------------------------- #

if __name__ == "__main__":
    B, STATE_DIM, ACTION_DIM, HIDDEN_DIM = 8, 16, 8, 2 ** 8

    key = jax.random.PRNGKey(0)
    kp, ks, ka = jax.random.split(key, 3)
    params = init_critic_params(kp, STATE_DIM, HIDDEN_DIM, ACTION_DIM)
    state = jax.random.normal(ks, (B, STATE_DIM), jnp.float32)
    action = jax.random.normal(ka, (B, ACTION_DIM), jnp.float32)

    # forward()  (single VMEM-resident invocation path)
    q1 = critic_forward(state, action, params)
    jax.block_until_ready(q1)
    q1_ref = critic_forward_ref(state, action, params)
    assert q1.shape == (B, 1)
    assert jnp.allclose(q1, q1_ref, atol=1e-2, rtol=1e-2)

    # get_q1_q2()  (fused twin-critic kernel)
    q1b, q2b = critic_get_q1_q2(state, action, params)
    jax.block_until_ready(q2b)
    q1r, q2r = critic_get_q1_q2_ref(state, action, params)
    assert jnp.allclose(q1b, q1r, atol=1e-2, rtol=1e-2)
    assert jnp.allclose(q2b, q2r, atol=1e-2, rtol=1e-2)

    # Exercise the batch-tiled grid path (what large-B / v7x megacore uses).
    Blarge = 512
    kS, kA = jax.random.split(jax.random.PRNGKey(1))
    state_l = jax.random.normal(kS, (Blarge, STATE_DIM), jnp.float32)
    action_l = jax.random.normal(kA, (Blarge, ACTION_DIM), jnp.float32)
    q1_l = critic_forward(state_l, action_l, params, block_b=256)
    jax.block_until_ready(q1_l)
    q1_l_ref = critic_forward_ref(state_l, action_l, params)
    assert q1_l.shape == (Blarge, 1)
    assert jnp.allclose(q1_l, q1_l_ref, atol=1e-2, rtol=1e-2)

    print("KERNEL_OK")
</pallas_src>

<mosaic_0001>
module attributes {stable_mosaic.version = 11 : i64} {
  func.func @_critic_q1_kernel(%arg0: i32, %arg1: memref<8x16xf32, #tpu.memory_space<vmem>>, %arg2: memref<8x8xf32, #tpu.memory_space<vmem>>, %arg3: memref<16x256xbf16, #tpu.memory_space<vmem>>, %arg4: memref<8x256xbf16, #tpu.memory_space<vmem>>, %arg5: memref<1x256xf32, #tpu.memory_space<vmem>>, %arg6: memref<256x256xbf16, #tpu.memory_space<vmem>>, %arg7: memref<1x256xf32, #tpu.memory_space<vmem>>, %arg8: memref<1x256xf32, #tpu.memory_space<vmem>>, %arg9: memref<1x1xf32, #tpu.memory_space<vmem>>, %arg10: memref<8x1xf32, #tpu.memory_space<vmem>>) attributes {dimension_semantics = [#tpu.dimension_semantics<parallel>], iteration_bounds = array<i64: 1>, scalar_prefetch = 0 : i64, scratch_operands = 0 : i64, tpu.core_type = #tpu.core_type<tc>, window_params = [{transform_indices = @transform_0, window_bounds = array<i64: 8, 16>}, {transform_indices = @transform_1, window_bounds = array<i64: 8, 8>}, {pipeline_mode = #tpu.pipeline_mode<synchronous>, transform_indices = @transform_2, window_bounds = array<i64: 16, 256>}, {pipeline_mode = #tpu.pipeline_mode<synchronous>, transform_indices = @transform_3, window_bounds = array<i64: 8, 256>}, {pipeline_mode = #tpu.pipeline_mode<synchronous>, transform_indices = @transform_4, window_bounds = array<i64: 1, 256>}, {pipeline_mode = #tpu.pipeline_mode<synchronous>, transform_indices = @transform_5, window_bounds = array<i64: 256, 256>}, {pipeline_mode = #tpu.pipeline_mode<synchronous>, transform_indices = @transform_6, window_bounds = array<i64: 1, 256>}, {pipeline_mode = #tpu.pipeline_mode<synchronous>, transform_indices = @transform_7, window_bounds = array<i64: 1, 256>}, {pipeline_mode = #tpu.pipeline_mode<synchronous>, transform_indices = @transform_8, window_bounds = array<i64: 1, 1>}, {transform_indices = @transform_9, window_bounds = array<i64: 8, 1>}]} {
    %c0 = arith.constant 0 : index
    %c0_0 = arith.constant 0 : index
    %0 = vector.load %arg1[%c0, %c0_0] : memref<8x16xf32, #tpu.memory_space<vmem>>, vector<8x16xf32>
    %1 = arith.truncf %0 : vector<8x16xf32> to vector<8x16xbf16>
    %c0_1 = arith.constant 0 : index
    %c0_2 = arith.constant 0 : index
    %2 = vector.load %arg3[%c0_1, %c0_2] : memref<16x256xbf16, #tpu.memory_space<vmem>>, vector<16x256xbf16>
    %cst = arith.constant dense<0.000000e+00> : vector<8x256xf32>
    %3 = tpu.matmul %1, %2, %cst {dimension_numbers = #tpu.dot_dimension_numbers<[1], [0], [0], [1], [0, 0, 1, 1], [], []>} : vector<8x16xbf16>, vector<16x256xbf16>, vector<8x256xf32> -> vector<8x256xf32>
    %c0_3 = arith.constant 0 : index
    %c0_4 = arith.constant 0 : index
    %4 = vector.load %arg2[%c0_3, %c0_4] : memref<8x8xf32, #tpu.memory_space<vmem>>, vector<8x8xf32>
    %5 = arith.truncf %4 : vector<8x8xf32> to vector<8x8xbf16>
    %c0_5 = arith.constant 0 : index
    %c0_6 = arith.constant 0 : index
    %6 = vector.load %arg4[%c0_5, %c0_6] : memref<8x256xbf16, #tpu.memory_space<vmem>>, vector<8x256xbf16>
    %cst_7 = arith.constant dense<0.000000e+00> : vector<8x256xf32>
    %7 = tpu.matmul %5, %6, %cst_7 {dimension_numbers = #tpu.dot_dimension_numbers<[1], [0], [0], [1], [0, 0, 1, 1], [], []>} : vector<8x8xbf16>, vector<8x256xbf16>, vector<8x256xf32> -> vector<8x256xf32>
    %8 = arith.addf %3, %7 : vector<8x256xf32>
    %c0_8 = arith.constant 0 : index
    %c0_9 = arith.constant 0 : index
    %9 = vector.load %arg5[%c0_8, %c0_9] : memref<1x256xf32, #tpu.memory_space<vmem>>, vector<1x256xf32>
    %10 = vector.broadcast %9 : vector<1x256xf32> to vector<8x256xf32>
    %11 = arith.addf %8, %10 : vector<8x256xf32>
    %cst_10 = arith.constant 0.000000e+00 : f32
    %12 = vector.broadcast %cst_10 : f32 to vector<8x256xf32>
    %13 = arith.maximumf %11, %12 : vector<8x256xf32>
    %14 = arith.truncf %13 : vector<8x256xf32> to vector<8x256xbf16>
    %c0_11 = arith.constant 0 : index
    %c0_12 = arith.constant 0 : index
    %15 = vector.load %arg6[%c0_11, %c0_12] : memref<256x256xbf16, #tpu.memory_space<vmem>>, vector<256x256xbf16>
    %cst_13 = arith.constant dense<0.000000e+00> : vector<8x256xf32>
    %16 = tpu.matmul %14, %15, %cst_13 {dimension_numbers = #tpu.dot_dimension_numbers<[1], [0], [0], [1], [0, 0, 1, 1], [], []>} : vector<8x256xbf16>, vector<256x256xbf16>, vector<8x256xf32> -> vector<8x256xf32>
    %c0_14 = arith.constant 0 : index
    %c0_15 = arith.constant 0 : index
    %17 = vector.load %arg7[%c0_14, %c0_15] : memref<1x256xf32, #tpu.memory_space<vmem>>, vector<1x256xf32>
    %18 = vector.broadcast %17 : vector<1x256xf32> to vector<8x256xf32>
    %19 = arith.addf %16, %18 : vector<8x256xf32>
    %cst_16 = arith.constant 0.000000e+00 : f32
    %20 = vector.broadcast %cst_16 : f32 to vector<8x256xf32>
    %21 = arith.maximumf %19, %20 : vector<8x256xf32>
    %c0_17 = arith.constant 0 : index
    %c0_18 = arith.constant 0 : index
    %22 = vector.load %arg8[%c0_17, %c0_18] : memref<1x256xf32, #tpu.memory_space<vmem>>, vector<1x256xf32>
    %23 = vector.broadcast %22 : vector<1x256xf32> to vector<8x256xf32>
    %24 = arith.mulf %21, %23 : vector<8x256xf32>
    %cst_19 = arith.constant dense<0.000000e+00> : vector<8xf32>
    %25 = vector.multi_reduction <add>, %24, %cst_19 [1] : vector<8x256xf32> to vector<8xf32>
    %26 = vector.shape_cast %25 : vector<8xf32> to vector<8x1xf32>
    %c0_20 = arith.constant 0 : index
    %c0_21 = arith.constant 0 : index
    %27 = vector.load %arg9[%c0_20, %c0_21] : memref<1x1xf32, #tpu.memory_space<vmem>>, vector<1x1xf32>
    %28 = vector.broadcast %27 : vector<1x1xf32> to vector<8x1xf32>
    %29 = arith.addf %26, %28 : vector<8x1xf32>
    %c0_22 = arith.constant 0 : index
    %c0_23 = arith.constant 0 : index
    %30 = vector.load %arg10[%c0_22, %c0_23] : memref<8x1xf32, #tpu.memory_space<vmem>>, vector<8x1xf32>
    tpu.vector_store %arg10[%c0_22, %c0_23], %29 {strides = array<i32>} : memref<8x1xf32, #tpu.memory_space<vmem>>, vector<8x1xf32>,
    return
  }
  func.func @transform_0(%arg0: i32) -> (i32, i32) {
    %c0_i32 = arith.constant 0 : i32
    %c0_i32_0 = arith.constant 0 : i32
    return %arg0, %c0_i32 : i32, i32
  }
  func.func @transform_1(%arg0: i32) -> (i32, i32) {
    %c0_i32 = arith.constant 0 : i32
    %c0_i32_0 = arith.constant 0 : i32
    return %arg0, %c0_i32 : i32, i32
  }
  func.func @transform_2(%arg0: i32) -> (i32, i32) {
    %c0_i32 = arith.constant 0 : i32
    %c0_i32_0 = arith.constant 0 : i32
    %c0_i32_1 = arith.constant 0 : i32
    return %c0_i32, %c0_i32_0 : i32, i32
  }
  func.func @transform_3(%arg0: i32) -> (i32, i32) {
    %c0_i32 = arith.constant 0 : i32
    %c0_i32_0 = arith.constant 0 : i32
    %c0_i32_1 = arith.constant 0 : i32
    return %c0_i32, %c0_i32_0 : i32, i32
  }
  func.func @transform_4(%arg0: i32) -> (i32, i32) {
    %c0_i32 = arith.constant 0 : i32
    %c0_i32_0 = arith.constant 0 : i32
    %c0_i32_1 = arith.constant 0 : i32
    return %c0_i32, %c0_i32_0 : i32, i32
  }
  func.func @transform_5(%arg0: i32) -> (i32, i32) {
    %c0_i32 = arith.constant 0 : i32
    %c0_i32_0 = arith.constant 0 : i32
    %c0_i32_1 = arith.constant 0 : i32
    return %c0_i32, %c0_i32_0 : i32, i32
  }
  func.func @transform_6(%arg0: i32) -> (i32, i32) {
    %c0_i32 = arith.constant 0 : i32
    %c0_i32_0 = arith.constant 0 : i32
    %c0_i32_1 = arith.constant 0 : i32
    return %c0_i32, %c0_i32_0 : i32, i32
  }
  func.func @transform_7(%arg0: i32) -> (i32, i32) {
    %c0_i32 = arith.constant 0 : i32
    %c0_i32_0 = arith.constant 0 : i32
    %c0_i32_1 = arith.constant 0 : i32
    return %c0_i32, %c0_i32_0 : i32, i32
  }
  func.func @transform_8(%arg0: i32) -> (i32, i32) {
    %c0_i32 = arith.constant 0 : i32
    %c0_i32_0 = arith.constant 0 : i32
    %c0_i32_1 = arith.constant 0 : i32
    return %c0_i32, %c0_i32_0 : i32, i32
  }
  func.func @transform_9(%arg0: i32) -> (i32, i32) {
    %c0_i32 = arith.constant 0 : i32
    %c0_i32_0 = arith.constant 0 : i32
    return %arg0, %c0_i32 : i32, i32
  }
}

</mosaic_0001>

<bundles_post_ra>
// kernel: tpu_custom_call.1
= control target key start
LH: loop header
LB: loop body
LE: loop exit
PB: predicated region body
PF: predicated region fallthrough
CT: control target
= control target key end

     0   :  { %s821_s0 = inlined_call_operand.hbm [shape: f32[8,16], index: 0, kind: input, shape index: {}]   ;;  %s822_s1 = inlined_call_operand.hbm [shape: f32[8,8], index: 1, kind: input, shape index: {}]   ;;  %s823_s2 = inlined_call_operand.hbm [shape: bf16[16,256], index: 2, kind: input, shape index: {}]   ;;  %s824_s3 = inlined_call_operand.vmem [shape: bf16[8,256], index: 3, kind: input, shape index: {}]   ;;  %s825_s4 = inlined_call_operand.vmem [shape: f32[1,256], index: 4, kind: input, shape index: {}]   ;;  %s826_s5 = inlined_call_operand.hbm [shape: bf16[256,256], index: 5, kind: input, shape index: {}]   ;;  %s827_s6 = inlined_call_operand.vmem [shape: f32[1,256], index: 6, kind: input, shape index: {}]   ;;  %s828_s7 = inlined_call_operand.vmem [shape: f32[1,256], index: 7, kind: input, shape index: {}]   ;;  %s829_s8 = inlined_call_operand.<no memory space> [shape: f32[1,1], index: 8, kind: input, shape index: {}]   ;;  %s830_s9 = inlined_call_operand.vmem [shape: f32[8,1], index: 9, kind: output, shape index: {}]  }
   0x1   :  { %v14_v0 = vstv %s829_s8 }
   0x2   :  { %15 = vst [vmem:[#allocation2] sm:$0x1] %v14_v0 }
   0x3   :  { %16 = vsyncpa [#allocation4], 0 }
   0x4   :  { %17 = vsyncpa [#allocation6], 0 }
   0x5   :  { %18 = vsyncpa [#allocation9], 0  ;;  %s698_s11 = smov [#allocation5]   ;;  %s699_s13 = smov [#allocation3]  }
   0x6   :  { %s35_s12 = sshll.u32 %s698_s11, 4  ;;  %s25_s14 = sshll.u32 %s699_s13, 4  ;;  %s36_s12 = int_to_ptr.vmem [resolvable:$true] %s35_s12  ;;  %s26_s14 = int_to_ptr.vmem [resolvable:$true] %s25_s14 }
   0x7   :  { %s604_s17 = scalar_lea.hbm %s822_s1, 128 }
   0x8   :  { %p605_p0 = scmp.ne.s32.totalorder %s822_s1, %s604_s17  ;;  %p608_p1 = scmp.lt.u32.totalorder %s604_s17, %s822_s1 }
   0xa   :  { %p610_p2 = pnand %p608_p1, %p605_p0 }
   0xc   :  { %613 = shalt.err (!%p610_p2)
}
   0xd   :  { %s614_s21 = scalar_lea.vmem %s36_s12, 128  ;;  %p619_p4 = scmp.lt.s32.totalorder %s36_s12, %s36_s12 }
   0xe   :  { %p615_p3 = scmp.ne.s32.totalorder %s36_s12, %s614_s21  ;;  %p620_p5 = scmp.lt.s32.totalorder %s614_s21, %s614_s21 }
  0x10   :  { %p621_p6 = por %p620_p5, %p619_p4 }
  0x12   :  { %p622_p7 = pnand %p621_p6, %p615_p3 }
  0x14   :  { %625 = shalt.err (!%p622_p7)
}
  0x15   :  { %38 = dma.hbm_to_vmem [thread:$0]  %s822_s1, 128, %s36_s12, [#allocation6]  }
  0x16   :  { %s626_s26 = scalar_lea.hbm %s821_s0, 128 }
  0x17   :  { %p627_p8 = scmp.ne.s32.totalorder %s821_s0, %s626_s26  ;;  %p630_p9 = scmp.lt.u32.totalorder %s626_s26, %s821_s0 }
  0x19   :  { %p632_p10 = pnand %p630_p9, %p627_p8 }
  0x1b   :  { %635 = shalt.err (!%p632_p10)
}
  0x1c   :  { %s636_s10 = scalar_lea.vmem %s26_s14, 128  ;;  %p641_p12 = scmp.lt.s32.totalorder %s26_s14, %s26_s14 }
  0x1d   :  { %p637_p11 = scmp.ne.s32.totalorder %s26_s14, %s636_s10  ;;  %p642_p13 = scmp.lt.s32.totalorder %s636_s10, %s636_s10 }
  0x1f   :  { %p643_p0 = por %p642_p13, %p641_p12 }
  0x21   :  { %p644_p1 = pnand %p643_p0, %p637_p11 }
  0x23   :  { %647 = shalt.err (!%p644_p1)
}
  0x24   :  { %28 = dma.hbm_to_vmem [thread:$0]  %s821_s0, 128, %s26_s14, [#allocation4]  }
  0x25   :  { %s700_s12 = smov [#allocation7]   ;;  %s648_s17 = scalar_lea.hbm %s823_s2, 256 }
  0x26   :  { %s44_s13 = sshll.u32 %s700_s12, 4  ;;  %p649_p2 = scmp.ne.s32.totalorder %s823_s2, %s648_s17  ;;  %s45_s13 = int_to_ptr.vmem [resolvable:$true] %s44_s13 }
  0x27   :  { %p652_p3 = scmp.lt.u32.totalorder %s648_s17, %s823_s2 }
  0x29   :  { %p654_p4 = pnand %p652_p3, %p649_p2 }
  0x2b   :  { %657 = shalt.err (!%p654_p4)
}
  0x2c   :  { %s658_s21 = scalar_lea.vmem %s45_s13, 256  ;;  %p663_p6 = scmp.lt.s32.totalorder %s45_s13, %s45_s13 }
  0x2d   :  { %p659_p5 = scmp.ne.s32.totalorder %s45_s13, %s658_s21  ;;  %p664_p7 = scmp.lt.s32.totalorder %s658_s21, %s658_s21 }
  0x2f   :  { %p665_p8 = por %p664_p7, %p663_p6 }
  0x31   :  { %p666_p9 = pnand %p665_p8, %p659_p5 }
  0x33   :  { %669 = shalt.err (!%p666_p9)
}
  0x34   :  { %s701_s0 = smov 128   ;;  %s702_s14 = smov 8  }
  0x35   :  { %50 = dma.hbm_to_vmem [thread:$0]  %s823_s2, 256, %s45_s13, [#allocation6], %s701_s0, %s701_s0, %s702_s14  }
  0x36   :  { %s703_s24 = smov [#allocation8]   ;;  %s670_s28 = scalar_lea.hbm %s826_s5, 4096 }
  0x37   :  { %s60_s25 = sshll.u32 %s703_s24, 4  ;;  %p671_p10 = scmp.ne.s32.totalorder %s826_s5, %s670_s28  ;;  %s61_s25 = int_to_ptr.vmem [resolvable:$true] %s60_s25 }
  0x38   :  { %p674_p11 = scmp.lt.u32.totalorder %s670_s28, %s826_s5 }
  0x3a   :  { %p676_p12 = pnand %p674_p11, %p671_p10 }
  0x3c   :  { %679 = shalt.err (!%p676_p12)
}
  0x3d   :  { %s680_s11 = scalar_lea.vmem %s61_s25, 4096  ;;  %p685_p0 = scmp.lt.s32.totalorder %s61_s25, %s61_s25 }
  0x3e   :  { %p681_p13 = scmp.ne.s32.totalorder %s61_s25, %s680_s11  ;;  %p686_p1 = scmp.lt.s32.totalorder %s680_s11, %s680_s11 }
  0x40   :  { %p687_p2 = por %p686_p1, %p685_p0 }
  0x42   :  { %p688_p3 = pnand %p687_p2, %p681_p13 }
  0x44   :  { %691 = shalt.err (!%p688_p3)
}
  0x45   :  { %66 = dma.hbm_to_vmem [thread:$0]  %s826_s5, 4096, %s61_s25, [#allocation9], %s701_s0, %s701_s0, %s702_s14  }
  0x46   :  { %692 = dma.done.wait [#allocation4], 128  }
  0x47   :  { %693 = vsyncadd [#allocation4], 4294967168 }
  0x48   :  { %694 = dma.done.wait [#allocation6], 384  }
  0x49   :  { %695 = vsyncadd [#allocation6], 4294966912 }
  0x4a   :  { %696 = dma.done.wait [#allocation9], 4096  }
  0x4b   :  { %697 = vsyncadd [#allocation9], 4294963200  ;;  %v704_v1 = vmov 0   ;;  %v92_v2 = vld [vmem:[%s824_s3] sm:$0xff]  ;;  %vm102_vm0 = vcmask 1043456   ;;  %v90_v3 = vld [vmem:[#allocation5] sm:$0xff]  ;;  %v207_v44 = vlaneseq }
  0x4c   :  { %141 = vmatprep.mubr.bf16.mxu1 %v704_v1  ;;  %v505_v4 = vcombine.high %v92_v2, %v92_v2  ;;  %v504_v5 = vcombine.low %v92_v2, %v92_v2  ;;  %v555_v6 = vld [vmem:[#allocation7 + $0x4] ss:$8 sps:$4 sm:$0xff]   ;;  %v91_v8 = vpack.c.bf16 %v90_v3, %v90_v3  ;;  %v556_v9 = vld [vmem:[#allocation8 + $0x4] ss:$8 sps:$4 sm:$0xff]   ;;  %v558_v10 = vld [vmem:[#allocation8] ss:$8 sps:$4 sm:$0xff]  }
  0x4d   :  { %vm98_vm1 = vcmask 64512   ;;  %v553_v11 = vld [vmem:[#allocation7] ss:$8 sps:$4 sm:$0xff]   ;;  %v559_v12 = vld [vmem:[#allocation8 + $0x14] ss:$8 sps:$4 sm:$0xff]   ;;  %427 = vmatprep.subr.bf16.mxu0 %v556_v9  ;;  %v86_v15 = vld [vmem:[#allocation3] sm:$0xff] }
  0x4e   :  { %506 = vmatprep.subr.msk.bf16.mxu1 %vm102_vm0, %v505_v4  ;;  %v104_v7 = vsel %vm102_vm0, %v504_v5, 0  ;;  %428 = vmatpush1.bf16.msra.mxu0 %v558_v10  ;;  %v561_v13 = vld [vmem:[#allocation8 + $0x10] ss:$8 sps:$4 sm:$0xff]   ;;  %v562_v14 = vld [vmem:[#allocation8 + $0x24] ss:$8 sps:$4 sm:$0xff]   ;;  %v87_v17 = vpack.c.bf16 %v86_v15, %v86_v15  ;;  %vm160_vm2 = vcmask 130048  }
  0x4f   :  { %110 = vmatpush1.bf16.msra.mxu1 %v104_v7  ;;  %429 = vmatprep.subr.bf16.mxu0 %v559_v12  ;;  %v564_v16 = vld [vmem:[#allocation8 + $0x20] ss:$8 sps:$4 sm:$0xff]   ;;  %v565_v18 = vld [vmem:[#allocation8 + $0x34] ss:$8 sps:$4 sm:$0xff]   ;;  %v567_v19 = vld [vmem:[#allocation8 + $0x30] ss:$8 sps:$4 sm:$0xff]  }
  0x50   :  { %164 = vmatprep.subr.bf16.mxu1 %v555_v6  ;;  %v568_v20 = vld [vmem:[#allocation8 + $0x44] ss:$8 sps:$4 sm:$0xff]   ;;  %v570_v21 = vld [vmem:[#allocation8 + $0x40] ss:$8 sps:$4 sm:$0xff]   ;;  %v571_v22 = vld [vmem:[#allocation8 + $0x54] ss:$8 sps:$4 sm:$0xff]  }
  0x51   :  { %v573_v23 = vld [vmem:[#allocation8 + $0x50] ss:$8 sps:$4 sm:$0xff]   ;;  %v574_v24 = vld [vmem:[#allocation8 + $0x64] ss:$8 sps:$4 sm:$0xff]   ;;  %v576_v25 = vld [vmem:[#allocation8 + $0x60] ss:$8 sps:$4 sm:$0xff]  }
  0x52   :  { %507 = vmatmul.mubr.msk.bf16.vlgmr.msra.gmra.mrb[0].mxu1 %vm98_vm1, %v91_v8  ;;  %430 = vmatpush1.bf16.msra.mxu0 %v561_v13  ;;  %v577_v26 = vld [vmem:[#allocation8 + $0x74] ss:$8 sps:$4 sm:$0xff]   ;;  %v579_v27 = vld [vmem:[#allocation8 + $0x70] ss:$8 sps:$4 sm:$0xff]   ;;  %v580_v28 = vld [vmem:[#allocation8 + $0x84] ss:$8 sps:$4 sm:$0xff]  }
  0x53   :  { %165 = vmatpush1.bf16.msra.mxu1 %v553_v11  ;;  %196 = vmatprep.mubr.bf16.mxu1 %v704_v1  ;;  %v582_v29 = vld [vmem:[#allocation8 + $0x80] ss:$8 sps:$4 sm:$0xff]   ;;  %v583_v30 = vld [vmem:[#allocation8 + $0x94] ss:$8 sps:$4 sm:$0xff]   ;;  %v585_v31 = vld [vmem:[#allocation8 + $0x90] ss:$8 sps:$4 sm:$0xff]  }
  0x54   :  { %431 = vmatprep.subr.bf16.mxu0 %v562_v14  ;;  %v586_v32 = vld [vmem:[#allocation8 + $0xa4] ss:$8 sps:$4 sm:$0xff]   ;;  %v588_v33 = vld [vmem:[#allocation8 + $0xa0] ss:$8 sps:$4 sm:$0xff]   ;;  %v589_v34 = vld [vmem:[#allocation8 + $0xb4] ss:$8 sps:$4 sm:$0xff]  }
  0x55   :  { %v591_v35 = vld [vmem:[#allocation8 + $0xb0] ss:$8 sps:$4 sm:$0xff]   ;;  %v592_v36 = vld [vmem:[#allocation8 + $0xc4] ss:$8 sps:$4 sm:$0xff]   ;;  %v594_v37 = vld [vmem:[#allocation8 + $0xc0] ss:$8 sps:$4 sm:$0xff]  }
  0x56   :  { %432 = vmatpush1.bf16.msra.mxu0 %v564_v16  ;;  %v595_v38 = vld [vmem:[#allocation8 + $0xd4] ss:$8 sps:$4 sm:$0xff]   ;;  %v597_v39 = vld [vmem:[#allocation8 + $0xd0] ss:$8 sps:$4 sm:$0xff]   ;;  %v598_v40 = vld [vmem:[#allocation8 + $0xe4] ss:$8 sps:$4 sm:$0xff]  }
  0x57   :  { %433 = vmatprep.subr.bf16.mxu0 %v565_v18  ;;  %v600_v41 = vld [vmem:[#allocation8 + $0xe0] ss:$8 sps:$4 sm:$0xff]   ;;  %v601_v42 = vld [vmem:[#allocation8 + $0xf4] ss:$8 sps:$4 sm:$0xff]   ;;  %v603_v43 = vld [vmem:[#allocation8 + $0xf0] ss:$8 sps:$4 sm:$0xff]  }
  0x58   :  { %v208_v45 = vshrl.u32 %v207_v44, 7  ;;  %v205_v51 = vld [vmem:[%s825_s4] sm:$0x3]  ;;  %vm495_vm3 = vcmask 7168  }
  0x59   :  { %v255_v3 = vld [vmem:[%s827_s6] sm:$0x3] }
  0x5a   :  { %510 = vmatmul.mubr.msk.bf16.vlgmr.msra.gmra.mrb[4].mxu1 %vm160_vm2, %v87_v17  ;;  %434 = vmatpush1.bf16.msra.mxu0 %v567_v19  ;;  %v209_v50 = vsub.s32 0, %v208_v45  ;;  %v213_v52 = vsub.s32 1, %v208_v45  ;;  %v470_v6 = vld [vmem:[%s828_s7] sm:$0x3] }
  0x5b   :  { %435 = vmatprep.subr.bf16.mxu0 %v568_v20  ;;  %v543_v20 = vld [vmem:[#allocation2] ss:$0 sm:$0xff] }
  0x5c   :  { %v210_v53 = vrot.slane %v205_v51, %v209_v50  ;;  %v214_v55 = vrot.slane %v205_v51, %v213_v52  ;;  %v260_v4 = vrot.slane %v255_v3, %v209_v50  ;;  %v264_v5 = vrot.slane %v255_v3, %v213_v52 }
  0x5d   :  { %v475_v10 = vrot.slane %v470_v6, %v209_v50  ;;  %v479_v13 = vrot.slane %v470_v6, %v213_v52 }
  0x5e   :  { %436 = vmatpush1.bf16.msra.mxu0 %v570_v21 }
  0x5f   :  { %437 = vmatprep.subr.bf16.mxu0 %v571_v22 }
  0x62   :  { %438 = vmatpush1.bf16.msra.mxu0 %v573_v23 }
  0x63   :  { %439 = vmatprep.subr.bf16.mxu0 %v574_v24 }
  0x66   :  { %440 = vmatpush1.bf16.msra.mxu0 %v576_v25 }
  0x67   :  { %441 = vmatprep.subr.bf16.mxu0 %v577_v26 }
  0x6a   :  { %442 = vmatpush1.bf16.msra.mxu0 %v579_v27 }
  0x6b   :  { %443 = vmatprep.subr.bf16.mxu0 %v580_v28 }
  0x6e   :  { %444 = vmatpush1.bf16.msra.mxu0 %v582_v29 }
  0x6f   :  { %445 = vmatprep.subr.bf16.mxu0 %v583_v30 }
  0x72   :  { %446 = vmatpush1.bf16.msra.mxu0 %v585_v31 }
  0x73   :  { %447 = vmatprep.subr.bf16.mxu0 %v586_v32 }
  0x76   :  { %448 = vmatpush1.bf16.msra.mxu0 %v588_v33 }
  0x77   :  { %449 = vmatprep.subr.bf16.mxu0 %v589_v34 }
  0x7a   :  { %450 = vmatpush1.bf16.msra.mxu0 %v591_v35 }
  0x7b   :  { %451 = vmatprep.subr.bf16.mxu0 %v592_v36 }
  0x7e   :  { %452 = vmatpush1.bf16.msra.mxu0 %v594_v37 }
  0x7f   :  { %453 = vmatprep.subr.bf16.mxu0 %v595_v38 }
  0x82   :  { %454 = vmatpush1.bf16.msra.mxu0 %v597_v39 }
  0x83   :  { %455 = vmatprep.subr.bf16.mxu0 %v598_v40 }
  0x86   :  { %456 = vmatpush1.bf16.msra.mxu0 %v600_v41 }
  0x87   :  { %457 = vmatprep.subr.bf16.mxu0 %v601_v42 }
  0x8a   :  { %458 = vmatpush1.bf16.msra.mxu0 %v603_v43 }
 0x125   :  { %v143_v46 = vpop.f32.mrb[0].mxu1 }
 0x126   :  { %v145_v47 = vpop.f32.mrb[1].mxu1 }
 0x127   :  { %v147_v48 = vpop.f32.mrb[2].mxu1 }
 0x128   :  { %v148_v49 = vpop.f32.mrb[3].mxu1 }
 0x12d   :  { %v198_v54 = vpop.f32.mrb[4].mxu1 }
 0x12e   :  { %v199_v56 = vadd.f32 %v198_v54, %v143_v46  ;;  %v200_v57 = vpop.f32.mrb[5].mxu1 }
 0x12f   :  { %v201_v58 = vadd.f32 %v200_v57, %v145_v47  ;;  %v202_v59 = vpop.f32.mrb[6].mxu1 }
 0x130   :  { %v217_v60 = vadd.f32 %v210_v53, %v199_v56  ;;  %v203_v61 = vpop.f32.mrb[7].mxu1 }
 0x131   :  { %v218_v62 = vadd.f32 %v214_v55, %v201_v58 }
 0x132   :  { %v219_v63 = vmax.f32 %v217_v60, 0.0 }
 0x133   :  { %v220_v0 = vmax.f32 %v218_v62, 0.0 }
 0x134   :  { %v221_v2 = vpack.c.bf16 %v219_v63, %v219_v63 }
 0x135   :  { %v222_v1 = vpack.c.bf16 %v220_v0, %v220_v0 }
 0x137   :  { %459 = vmatprep.mubr.bf16.mxu0 %v222_v1 }
 0x138   :  { %460 = vmatmul.mubr.bf16.vlgmr.msra.gmra.mrb[0].mxu0 %v221_v2 }
 0x20b   :  { %v461_v7 = vpop.f32.mrb[0].mxu0 }
 0x20c   :  { %v462_v8 = vadd.f32 %v461_v7, %v260_v4  ;;  %v463_v9 = vpop.f32.mrb[1].mxu0 }
 0x20d   :  { %v464_v11 = vadd.f32 %v463_v9, %v264_v5  ;;  %v465_v12 = vpop.f32.mrb[2].mxu0 }
 0x20e   :  { %v468_v14 = vmax.f32 %v462_v8, 0.0  ;;  %v466_v15 = vpop.f32.mrb[3].mxu0 }
 0x20f   :  { %v469_v16 = vmax.f32 %v464_v11, 0.0 }
 0x210   :  { %v482_v17 = vmul.f32 %v475_v10, %v468_v14 }
 0x211   :  { %v483_v18 = vmul.f32 %v479_v13, %v469_v16 }
 0x213   :  { %v484_v19 = vadd.f32 %v483_v18, %v482_v17 }
 0x215   :  { %485 = vadd.xlane.f32.xlu0 %v484_v19 }
 0x2a2   :  { %v486_v21 = vpop.xlane.xlu0 %485 }
 0x2a3   :  { %v494_v22 = vadd.f32 %v543_v20, %v486_v21 }
 0x2a5   :  { %496 = vst.msk [vmem:[%s830_s9] sm:$0xff] %vm495_vm3, %v494_v22 }
 0x2a6   :  { %501 = vsyncpa [#allocation4], 1 }
 0x2a7   :  { %502 = vsyncpa [#allocation6], 1 }
 0x2a8   :  { %503 = vsyncpa [#allocation9], 1 }

</bundles_post_ra>
